<compile_context>
chip_gen: v7x
topology: tpu7x:2x2x1
jax: 0.10.0
libtpu: 0.0.40
codegen_flags: <defaults>
</compile_context>

<pallas_src>
import functools
import math

import jax
import jax.numpy as jnp
from jax.experimental import pallas as pl
from jax.experimental.pallas import tpu as pltpu

EPS = 1e-5     # nn.LayerNorm default eps
GROUPS = 32    # 32 * 20 = 640 lanes; do NOT raise (MXU work scales with G)


def _split2_bf16(v):
    """2-term bf16 split of an f32 array: v ≈ hi + lo, both exactly bf16."""
    hi = v.astype(jnp.bfloat16)
    lo = (v - hi.astype(jnp.float32)).astype(jnp.bfloat16)
    return hi, lo


def _split3_bf16_lanes(v):
    """3-term bf16 split concatenated along lanes: (TR, G) f32 -> (TR, 3G) bf16."""
    v1 = v.astype(jnp.bfloat16).astype(jnp.float32)
    r1 = v - v1
    v2 = r1.astype(jnp.bfloat16).astype(jnp.float32)
    v3 = r1 - v2
    return jnp.concatenate([v1, v2, v3], axis=1).astype(jnp.bfloat16)


def _layernorm_kernel(x_ref, g_ref, b_ref, s_ref, bc_ref, o_ref, *, eps, d):
    """Grouped, lane-dense LayerNorm.

    x_ref:  (TR, G*D)  G independent LayerNorm groups packed along the lane axis.
    g_ref:  (1, G*D)   gamma tiled G times (resident, f32).
    b_ref:  (1, G*D)   beta tiled G times (resident, f32).
    s_ref:  (G*D, G)   0/1 block-diagonal selector: lane -> group sum (bf16, resident).
    bc_ref: (3G, G*D)  [S^T;S^T;S^T]: group -> lane broadcast for a 3-term split (bf16, resident).
    """
    f32 = jnp.float32
    x = x_ref[...].astype(f32)                    # (TR, G*D)
    s = s_ref[...]                                # (G*D, G) bf16 0/1
    bc = bc_ref[...]                              # (3G, G*D) bf16 0/1

    # Per-group sums of x and x^2 on the MXU: single-pass bf16 dots on an exact
    # hi/lo split (selector is exact in bf16, accumulation is f32).
    xh, xl = _split2_bf16(x)
    x2 = x * x
    x2h, x2l = _split2_bf16(x2)
    sum_x = (jnp.dot(xh, s, preferred_element_type=f32) +
             jnp.dot(xl, s, preferred_element_type=f32))          # (TR, G)
    sum_x2 = (jnp.dot(x2h, s, preferred_element_type=f32) +
              jnp.dot(x2l, s, preferred_element_type=f32))        # (TR, G)

    # Small (TR, G) per-group statistics; variance as E[x^2] - mean^2.
    inv_d = jnp.float32(1.0 / d)
    mean = sum_x * inv_d
    var = jnp.maximum(sum_x2 * inv_d - mean * mean, 0.0)
    inv = jax.lax.rsqrt(var + eps)
    a = inv                                       # per-group scale
    b = -mean * inv                               # per-group shift (pre-affine)

    # Exact group -> lane broadcast: one bf16 dot per statistic; the 3-term
    # split (K = 3G = 96) disappears into the 128/256-wide MXU tile padding.
    a_b = jnp.dot(_split3_bf16_lanes(a), bc, preferred_element_type=f32)   # (TR, G*D)
    b_b = jnp.dot(_split3_bf16_lanes(b), bc, preferred_element_type=f32)   # (TR, G*D)

    y = (x * a_b + b_b) * g_ref[...] + b_ref[...]
    o_ref[...] = y.astype(o_ref.dtype)


def layernorm_stack(x, gamma, beta, eps=EPS):
    """LayerNorm over the last two dims of x (normalized_shape = gamma.shape)."""
    norm_shape = gamma.shape                       # (4, 5)
    nd = len(norm_shape)
    assert x.shape[-nd:] == norm_shape
    d = math.prod(norm_shape)                      # 20
    lead = x.shape[:-nd]
    r = math.prod(lead) if lead else 1

    g = GROUPS
    L = g * d                                      # 640 lanes

    # Pick the row tile / VMEM budget per generation (v7x: 64 MiB physical).
    try:
        vmem_cap = pltpu.get_tpu_info().vmem_capacity_bytes
    except Exception:
        vmem_cap = 64 * 1024 * 1024
    if vmem_cap >= 96 * 1024 * 1024:
        target_tr, vmem_limit = 2048, 96 * 1024 * 1024
    else:
        target_tr, vmem_limit = 1024, 48 * 1024 * 1024

    x2d = x.reshape(r, d)
    # Rows must be a multiple of 32 for the pure-metadata lane repack; also keep
    # at least 8 packed rows so every MXU operand has an aligned sublane count.
    # For r % 32 == 0 and r >= 256 this adds ZERO padding / extra HBM traffic.
    r_pack = max(((r + g - 1) // g) * g, 8 * g)
    if r_pack != r:
        x2d = jnp.pad(x2d, ((0, r_pack - r), (0, 0)))   # only small / misaligned tails
    rp = r_pack // g
    xp = x2d.reshape(rp, L)                        # pure-metadata repack: 640 lanes

    tr = min(target_tr, (rp // 8) * 8)             # multiple of 8; edge block clipped by Pallas
    grid = (pl.cdiv(rp, tr),)

    # Tiny resident constants.
    lane_gid = jnp.arange(L, dtype=jnp.int32) // d
    gid = jnp.arange(g, dtype=jnp.int32)
    sel = (lane_gid[:, None] == gid[None, :]).astype(jnp.bfloat16)      # (640, 32)
    sel_t = (gid[:, None] == lane_gid[None, :]).astype(jnp.bfloat16)    # (32, 640)
    bcast = jnp.concatenate([sel_t, sel_t, sel_t], axis=0)              # (96, 640)
    g_tiled = jnp.tile(gamma.reshape(1, d).astype(jnp.float32), (1, g))  # (1, 640)
    b_tiled = jnp.tile(beta.reshape(1, d).astype(jnp.float32), (1, g))   # (1, 640)

    out_p = pl.pallas_call(
        functools.partial(_layernorm_kernel, eps=float(eps), d=d),
        out_shape=jax.ShapeDtypeStruct((rp, L), x.dtype),
        grid=grid,
        in_specs=[
            pl.BlockSpec((tr, L), lambda i: (i, 0)),      # x rows (pipelined)
            pl.BlockSpec((1, L), lambda i: (0, 0)),       # gamma (resident)
            pl.BlockSpec((1, L), lambda i: (0, 0)),       # beta (resident)
            pl.BlockSpec((L, g), lambda i: (0, 0)),       # reduce selector (resident)
            pl.BlockSpec((3 * g, L), lambda i: (0, 0)),   # broadcast selector (resident)
        ],
        out_specs=pl.BlockSpec((tr, L), lambda i: (i, 0)),
        compiler_params=pltpu.CompilerParams(
            dimension_semantics=("parallel",),
            vmem_limit_bytes=vmem_limit,
        ),
    )(xp, g_tiled, b_tiled, sel, bcast)

    out2d = out_p.reshape(r_pack, d)
    if r_pack != r:
        out2d = out2d[:r]
    return out2d.reshape(*lead, *norm_shape)


def _reference(x, gamma, beta, eps=EPS):
    xf = x.astype(jnp.float32)
    mean = jnp.mean(xf, axis=(-2, -1), keepdims=True)
    var = jnp.mean((xf - mean) ** 2, axis=(-2, -1), keepdims=True)
    return ((xf - mean) * jax.lax.rsqrt(var + eps) * gamma + beta).astype(x.dtype)


if __name__ == "__main__":
    key = jax.random.PRNGKey(0)

    # Input consistent with LayerNorm((4,5)): trailing dims must be (4,5).
    x = jax.random.normal(key, (2, 3, 4, 5), dtype=jnp.float32)

    # Deterministic, non-trivial affine parameters (nn.LayerNorm defaults are
    # ones/zeros; use varying values to exercise the affine path).
    gamma = (1.0 + 0.01 * jnp.arange(20, dtype=jnp.float32)).reshape(4, 5)
    beta = (0.001 * jnp.arange(20, dtype=jnp.float32)).reshape(4, 5)

    out = layernorm_stack(x, gamma, beta)
    out = jax.block_until_ready(out)

    ref = _reference(x, gamma, beta)
    assert out.shape == x.shape
    assert jnp.allclose(out, ref, atol=1e-5, rtol=1e-5), float(
        jnp.max(jnp.abs(out - ref)))

    print("KERNEL_OK")
</pallas_src>

<mosaic_0001>
module attributes {stable_mosaic.version = 11 : i64} {
  func.func @_layernorm_kernel(%arg0: i32, %arg1: memref<8x640xf32, #tpu.memory_space<vmem>>, %arg2: memref<1x640xf32, #tpu.memory_space<vmem>>, %arg3: memref<1x640xf32, #tpu.memory_space<vmem>>, %arg4: memref<640x32xbf16, #tpu.memory_space<vmem>>, %arg5: memref<96x640xbf16, #tpu.memory_space<vmem>>, %arg6: memref<8x640xf32, #tpu.memory_space<vmem>>) attributes {dimension_semantics = [#tpu.dimension_semantics<parallel>], iteration_bounds = array<i64: 1>, scalar_prefetch = 0 : i64, scratch_operands = 0 : i64, tpu.core_type = #tpu.core_type<tc>, window_params = [{transform_indices = @transform_0, window_bounds = array<i64: 8, 640>}, {pipeline_mode = #tpu.pipeline_mode<synchronous>, transform_indices = @transform_1, window_bounds = array<i64: 1, 640>}, {pipeline_mode = #tpu.pipeline_mode<synchronous>, transform_indices = @transform_2, window_bounds = array<i64: 1, 640>}, {pipeline_mode = #tpu.pipeline_mode<synchronous>, transform_indices = @transform_3, window_bounds = array<i64: 640, 32>}, {pipeline_mode = #tpu.pipeline_mode<synchronous>, transform_indices = @transform_4, window_bounds = array<i64: 96, 640>}, {transform_indices = @transform_5, window_bounds = array<i64: 8, 640>}]} {
    %c0 = arith.constant 0 : index
    %c0_0 = arith.constant 0 : index
    %0 = vector.load %arg1[%c0, %c0_0] : memref<8x640xf32, #tpu.memory_space<vmem>>, vector<8x640xf32>
    %c0_1 = arith.constant 0 : index
    %c0_2 = arith.constant 0 : index
    %1 = vector.load %arg4[%c0_1, %c0_2] : memref<640x32xbf16, #tpu.memory_space<vmem>>, vector<640x32xbf16>
    %c0_3 = arith.constant 0 : index
    %c0_4 = arith.constant 0 : index
    %2 = vector.load %arg5[%c0_3, %c0_4] : memref<96x640xbf16, #tpu.memory_space<vmem>>, vector<96x640xbf16>
    %3 = arith.truncf %0 : vector<8x640xf32> to vector<8x640xbf16>
    %4 = arith.extf %3 : vector<8x640xbf16> to vector<8x640xf32>
    %5 = arith.subf %0, %4 : vector<8x640xf32>
    %6 = arith.truncf %5 : vector<8x640xf32> to vector<8x640xbf16>
    %7 = arith.mulf %0, %0 : vector<8x640xf32>
    %8 = arith.truncf %7 : vector<8x640xf32> to vector<8x640xbf16>
    %9 = arith.extf %8 : vector<8x640xbf16> to vector<8x640xf32>
    %10 = arith.subf %7, %9 : vector<8x640xf32>
    %11 = arith.truncf %10 : vector<8x640xf32> to vector<8x640xbf16>
    %cst = arith.constant dense<0.000000e+00> : vector<8x32xf32>
    %12 = tpu.matmul %3, %1, %cst {dimension_numbers = #tpu.dot_dimension_numbers<[1], [0], [0], [1], [0, 0, 1, 1], [], []>} : vector<8x640xbf16>, vector<640x32xbf16>, vector<8x32xf32> -> vector<8x32xf32>
    %cst_5 = arith.constant dense<0.000000e+00> : vector<8x32xf32>
    %13 = tpu.matmul %6, %1, %cst_5 {dimension_numbers = #tpu.dot_dimension_numbers<[1], [0], [0], [1], [0, 0, 1, 1], [], []>} : vector<8x640xbf16>, vector<640x32xbf16>, vector<8x32xf32> -> vector<8x32xf32>
    %14 = arith.addf %12, %13 : vector<8x32xf32>
    %cst_6 = arith.constant dense<0.000000e+00> : vector<8x32xf32>
    %15 = tpu.matmul %8, %1, %cst_6 {dimension_numbers = #tpu.dot_dimension_numbers<[1], [0], [0], [1], [0, 0, 1, 1], [], []>} : vector<8x640xbf16>, vector<640x32xbf16>, vector<8x32xf32> -> vector<8x32xf32>
    %cst_7 = arith.constant dense<0.000000e+00> : vector<8x32xf32>
    %16 = tpu.matmul %11, %1, %cst_7 {dimension_numbers = #tpu.dot_dimension_numbers<[1], [0], [0], [1], [0, 0, 1, 1], [], []>} : vector<8x640xbf16>, vector<640x32xbf16>, vector<8x32xf32> -> vector<8x32xf32>
    %17 = arith.addf %15, %16 : vector<8x32xf32>
    %cst_8 = arith.constant 5.000000e-02 : f32
    %18 = vector.broadcast %cst_8 : f32 to vector<8x32xf32>
    %19 = arith.mulf %14, %18 : vector<8x32xf32>
    %cst_9 = arith.constant 5.000000e-02 : f32
    %20 = vector.broadcast %cst_9 : f32 to vector<8x32xf32>
    %21 = arith.mulf %17, %20 : vector<8x32xf32>
    %22 = arith.mulf %19, %19 : vector<8x32xf32>
    %23 = arith.subf %21, %22 : vector<8x32xf32>
    %cst_10 = arith.constant 0.000000e+00 : f32
    %24 = vector.broadcast %cst_10 : f32 to vector<8x32xf32>
    %25 = arith.maximumf %23, %24 : vector<8x32xf32>
    %cst_11 = arith.constant 9.99999974E-6 : f32
    %26 = vector.broadcast %cst_11 : f32 to vector<8x32xf32>
    %27 = arith.addf %25, %26 : vector<8x32xf32>
    %28 = math.rsqrt %27 : vector<8x32xf32>
    %cst_12 = arith.constant 0.000000e+00 : f32
    %29 = vector.broadcast %cst_12 : f32 to vector<8x32xf32>
    %30 = arith.subf %29, %19 : vector<8x32xf32>
    %31 = arith.mulf %30, %28 : vector<8x32xf32>
    %32 = arith.truncf %28 : vector<8x32xf32> to vector<8x32xbf16>
    %33 = arith.extf %32 : vector<8x32xbf16> to vector<8x32xf32>
    %34 = arith.subf %28, %33 : vector<8x32xf32>
    %35 = arith.truncf %34 : vector<8x32xf32> to vector<8x32xbf16>
    %36 = arith.extf %35 : vector<8x32xbf16> to vector<8x32xf32>
    %37 = arith.subf %34, %36 : vector<8x32xf32>
    %38 = tpu.concatenate %33, %36, %37 in 1 : vector<8x32xf32>, vector<8x32xf32>, vector<8x32xf32> -> vector<8x96xf32>
    %39 = arith.truncf %38 : vector<8x96xf32> to vector<8x96xbf16>
    %cst_13 = arith.constant dense<0.000000e+00> : vector<8x640xf32>
    %40 = tpu.matmul %39, %2, %cst_13 {dimension_numbers = #tpu.dot_dimension_numbers<[1], [0], [0], [1], [0, 0, 1, 1], [], []>} : vector<8x96xbf16>, vector<96x640xbf16>, vector<8x640xf32> -> vector<8x640xf32>
    %41 = arith.truncf %31 : vector<8x32xf32> to vector<8x32xbf16>
    %42 = arith.extf %41 : vector<8x32xbf16> to vector<8x32xf32>
    %43 = arith.subf %31, %42 : vector<8x32xf32>
    %44 = arith.truncf %43 : vector<8x32xf32> to vector<8x32xbf16>
    %45 = arith.extf %44 : vector<8x32xbf16> to vector<8x32xf32>
    %46 = arith.subf %43, %45 : vector<8x32xf32>
    %47 = tpu.concatenate %42, %45, %46 in 1 : vector<8x32xf32>, vector<8x32xf32>, vector<8x32xf32> -> vector<8x96xf32>
    %48 = arith.truncf %47 : vector<8x96xf32> to vector<8x96xbf16>
    %cst_14 = arith.constant dense<0.000000e+00> : vector<8x640xf32>
    %49 = tpu.matmul %48, %2, %cst_14 {dimension_numbers = #tpu.dot_dimension_numbers<[1], [0], [0], [1], [0, 0, 1, 1], [], []>} : vector<8x96xbf16>, vector<96x640xbf16>, vector<8x640xf32> -> vector<8x640xf32>
    %50 = arith.mulf %0, %40 : vector<8x640xf32>
    %51 = arith.addf %50, %49 : vector<8x640xf32>
    %c0_15 = arith.constant 0 : index
    %c0_16 = arith.constant 0 : index
    %52 = vector.load %arg2[%c0_15, %c0_16] : memref<1x640xf32, #tpu.memory_space<vmem>>, vector<1x640xf32>
    %53 = vector.broadcast %52 : vector<1x640xf32> to vector<8x640xf32>
    %54 = arith.mulf %51, %53 : vector<8x640xf32>
    %c0_17 = arith.constant 0 : index
    %c0_18 = arith.constant 0 : index
    %55 = vector.load %arg3[%c0_17, %c0_18] : memref<1x640xf32, #tpu.memory_space<vmem>>, vector<1x640xf32>
    %56 = vector.broadcast %55 : vector<1x640xf32> to vector<8x640xf32>
    %57 = arith.addf %54, %56 : vector<8x640xf32>
    %c0_19 = arith.constant 0 : index
    %c0_20 = arith.constant 0 : index
    %58 = vector.load %arg6[%c0_19, %c0_20] : memref<8x640xf32, #tpu.memory_space<vmem>>, vector<8x640xf32>
    tpu.vector_store %arg6[%c0_19, %c0_20], %57 {strides = array<i32>} : memref<8x640xf32, #tpu.memory_space<vmem>>, vector<8x640xf32>,
    return
  }
  func.func @transform_0(%arg0: i32) -> (i32, i32) {
    %c0_i32 = arith.constant 0 : i32
    %c0_i32_0 = arith.constant 0 : i32
    return %arg0, %c0_i32 : i32, i32
  }
  func.func @transform_1(%arg0: i32) -> (i32, i32) {
    %c0_i32 = arith.constant 0 : i32
    %c0_i32_0 = arith.constant 0 : i32
    %c0_i32_1 = arith.constant 0 : i32
    return %c0_i32, %c0_i32_0 : i32, i32
  }
  func.func @transform_2(%arg0: i32) -> (i32, i32) {
    %c0_i32 = arith.constant 0 : i32
    %c0_i32_0 = arith.constant 0 : i32
    %c0_i32_1 = arith.constant 0 : i32
    return %c0_i32, %c0_i32_0 : i32, i32
  }
  func.func @transform_3(%arg0: i32) -> (i32, i32) {
    %c0_i32 = arith.constant 0 : i32
    %c0_i32_0 = arith.constant 0 : i32
    %c0_i32_1 = arith.constant 0 : i32
    return %c0_i32, %c0_i32_0 : i32, i32
  }
  func.func @transform_4(%arg0: i32) -> (i32, i32) {
    %c0_i32 = arith.constant 0 : i32
    %c0_i32_0 = arith.constant 0 : i32
    %c0_i32_1 = arith.constant 0 : i32
    return %c0_i32, %c0_i32_0 : i32, i32
  }
  func.func @transform_5(%arg0: i32) -> (i32, i32) {
    %c0_i32 = arith.constant 0 : i32
    %c0_i32_0 = arith.constant 0 : i32
    return %arg0, %c0_i32 : i32, i32
  }
}

</mosaic_0001>

<bundles_post_ra>
// kernel: tpu_custom_call.1
= control target key start
LH: loop header
LB: loop body
LE: loop exit
PB: predicated region body
PF: predicated region fallthrough
CT: control target
= control target key end

     0   :  { %v1999_v39 = vmov 0.0   ;;  %vm2000_vm0 = vmmov 0   ;;  %s2677_s0 = inlined_call_operand.vmem [shape: f32[8,640], index: 0, kind: input, shape index: {}]   ;;  %s2678_s1 = inlined_call_operand.vmem [shape: f32[1,640], index: 1, kind: input, shape index: {}]   ;;  %s2679_s2 = inlined_call_operand.vmem [shape: f32[1,640], index: 2, kind: input, shape index: {}]   ;;  %s2680_s3 = inlined_call_operand.vmem [shape: bf16[640,32], index: 3, kind: input, shape index: {}]   ;;  %s2681_s4 = inlined_call_operand.vmem [shape: bf16[96,640], index: 4, kind: input, shape index: {}]   ;;  %s2682_s5 = inlined_call_operand.hbm [shape: f32[8,640], index: 5, kind: output, shape index: {}]  }
   0x1   :  { %v2038_v0 = vld [vmem:[%s2680_s3 + $0x40] sm:$0xff]   ;;  %v2061_v4 = vld [vmem:[%s2680_s3 + $0x48] sm:$0xff]   ;;  %v2085_v8 = vld [vmem:[%s2680_s3 + $0x50] sm:$0xff]  }
   0x2   :  { %v2043_v1 = vld [vmem:[%s2680_s3 + $0xc0] sm:$0xff]   ;;  %1529 = vmatprep.subr.bf16.mxu0 %v2038_v0  ;;  %v2067_v5 = vld [vmem:[%s2680_s3 + $0xc8] sm:$0xff]   ;;  %v2091_v9 = vld [vmem:[%s2680_s3 + $0xd0] sm:$0xff]  }
   0x3   :  { %v2049_v2 = vld [vmem:[%s2680_s3] sm:$0xff]   ;;  %1551 = vmatprep.subr.bf16.mxu1 %v2043_v1  ;;  %v2073_v6 = vld [vmem:[%s2680_s3 + $0x8] sm:$0xff]   ;;  %v2097_v10 = vld [vmem:[%s2680_s3 + $0x10] sm:$0xff]  }
   0x4   :  { %v2055_v3 = vld [vmem:[%s2680_s3 + $0x80] sm:$0xff]   ;;  %1530 = vmatpush3.bf16.msra.mxu0 %v2049_v2  ;;  %v2079_v7 = vld [vmem:[%s2680_s3 + $0x88] sm:$0xff]   ;;  %v2103_v11 = vld [vmem:[%s2680_s3 + $0x90] sm:$0xff]  }
   0x5   :  { %1552 = vmatpush3.bf16.msra.mxu1 %v2055_v3  ;;  %1531 = vmatprep.subr.bf16.mxu0 %v2061_v4  ;;  %v2109_v12 = vld [vmem:[%s2680_s3 + $0x58] sm:$0xff]   ;;  %v2133_v16 = vld [vmem:[%s2680_s3 + $0x60] sm:$0xff]   ;;  %v2157_v20 = vld [vmem:[%s2680_s3 + $0x68] sm:$0xff]  }
   0x6   :  { %1553 = vmatprep.subr.bf16.mxu1 %v2067_v5  ;;  %v2115_v13 = vld [vmem:[%s2680_s3 + $0xd8] sm:$0xff]   ;;  %v2139_v17 = vld [vmem:[%s2680_s3 + $0xe0] sm:$0xff]   ;;  %v2163_v21 = vld [vmem:[%s2680_s3 + $0xe8] sm:$0xff]  }
   0x7   :  { %v2121_v14 = vld [vmem:[%s2680_s3 + $0x18] sm:$0xff]   ;;  %v2145_v18 = vld [vmem:[%s2680_s3 + $0x20] sm:$0xff]   ;;  %v2169_v22 = vld [vmem:[%s2680_s3 + $0x28] sm:$0xff]  }
   0x8   :  { %1532 = vmatpush3.bf16.msra.mxu0 %v2073_v6  ;;  %v2127_v15 = vld [vmem:[%s2680_s3 + $0x98] sm:$0xff]   ;;  %v2151_v19 = vld [vmem:[%s2680_s3 + $0xa0] sm:$0xff]   ;;  %v2175_v23 = vld [vmem:[%s2680_s3 + $0xa8] sm:$0xff]  }
   0x9   :  { %1554 = vmatpush3.bf16.msra.mxu1 %v2079_v7  ;;  %1533 = vmatprep.subr.bf16.mxu0 %v2085_v8  ;;  %v2181_v24 = vld [vmem:[%s2680_s3 + $0x70] sm:$0xff]   ;;  %v2205_v28 = vld [vmem:[%s2680_s3 + $0x78] sm:$0xff]   ;;  %v23_v32 = vld [vmem:[%s2677_s0 + $0x8] sm:$0xff] }
   0xa   :  { %1555 = vmatprep.subr.bf16.mxu1 %v2091_v9  ;;  %v2187_v25 = vld [vmem:[%s2680_s3 + $0xf0] sm:$0xff]   ;;  %v2211_v29 = vld [vmem:[%s2680_s3 + $0xf8] sm:$0xff]   ;;  %v2237_v34 = vld [vmem:[%s2677_s0] sm:$0xff]  ;;  %v144_v35 = vpack.c.bf16 %v23_v32, %v23_v32 }
   0xb   :  { %v2193_v26 = vld [vmem:[%s2680_s3 + $0x30] sm:$0xff]   ;;  %v2217_v30 = vld [vmem:[%s2680_s3 + $0x38] sm:$0xff]   ;;  %v2246_v37 = vpack.c.bf16 %v2237_v34, %v2237_v34  ;;  %v2268_v52 = vld [vmem:[%s2680_s3 + $0x100] sm:$0xff]  }
   0xc   :  { %1534 = vmatpush3.bf16.msra.mxu0 %v2097_v10  ;;  %v2199_v27 = vld [vmem:[%s2680_s3 + $0xb0] sm:$0xff]   ;;  %v2223_v31 = vld [vmem:[%s2680_s3 + $0xb8] sm:$0xff]   ;;  %v149_v41 = vunpack.c.l.bf16 %v144_v35  ;;  %v2273_v54 = vld [vmem:[%s2680_s3 + $0x108] sm:$0xff]  }
   0xd   :  { %1556 = vmatpush3.bf16.msra.mxu1 %v2103_v11  ;;  %1535 = vmatprep.subr.bf16.mxu0 %v2109_v12  ;;  %v2232_v33 = vld [vmem:[%s2677_s0 + $0x18] sm:$0xff]  ;;  %v2251_v38 = vld [vmem:[%s2677_s0 + $0x10] sm:$0xff]  ;;  %v148_v43 = vunpack.c.l.bf16 %v2246_v37 }
   0xe   :  { %1557 = vmatprep.subr.bf16.mxu1 %v2115_v13  ;;  %v2242_v36 = vpack.c.bf16 %v2232_v33, %v2232_v33  ;;  %v2256_v40 = vpack.c.bf16 %v2251_v38, %v2251_v38  ;;  %v154_v45 = vsub.f32 %v23_v32, %v149_v41  ;;  %v2282_v55 = vld [vmem:[%s2680_s3 + $0x110] sm:$0xff]   ;;  %v2293_v56 = vld [vmem:[%s2680_s3 + $0x118] sm:$0xff]  }
   0xf   :  { %v153_v47 = vsub.f32 %v2237_v34, %v148_v43 }
  0x10   :  { %1536 = vmatpush3.bf16.msra.mxu0 %v2121_v14  ;;  %v151_v42 = vunpack.c.l.bf16 %v2242_v36  ;;  %v150_v44 = vunpack.c.l.bf16 %v2256_v40  ;;  %v159_v49 = vpack.c.bf16 %v154_v45, %v154_v45 }
  0x11   :  { %1558 = vmatpush3.bf16.msra.mxu1 %v2127_v15  ;;  %1537 = vmatprep.subr.bf16.mxu0 %v2133_v16  ;;  %v158_v51 = vpack.c.bf16 %v153_v47, %v153_v47 }
  0x12   :  { %1559 = vmatprep.subr.bf16.mxu1 %v2139_v17  ;;  %v156_v46 = vsub.f32 %v2232_v33, %v151_v42  ;;  %v155_v48 = vsub.f32 %v2251_v38, %v150_v44  ;;  %460 = vmatprep.mubr.bf16.mxu0 %v159_v49 }
  0x14   :  { %1538 = vmatpush3.bf16.msra.mxu0 %v2145_v18  ;;  %v161_v50 = vpack.c.bf16 %v156_v46, %v156_v46  ;;  %v160_v53 = vpack.c.bf16 %v155_v48, %v155_v48 }
  0x15   :  { %1560 = vmatpush3.bf16.msra.mxu1 %v2151_v19  ;;  %1539 = vmatprep.subr.bf16.mxu0 %v2157_v20 }
  0x16   :  { %1561 = vmatprep.subr.bf16.mxu1 %v2163_v21  ;;  %500 = vmatprep.mubr.bf16.mxu1 %v161_v50 }
  0x18   :  { %1540 = vmatpush3.bf16.msra.mxu0 %v2169_v22 }
  0x19   :  { %1562 = vmatpush3.bf16.msra.mxu1 %v2175_v23  ;;  %1541 = vmatprep.subr.bf16.mxu0 %v2181_v24 }
  0x1a   :  { %1563 = vmatprep.subr.bf16.mxu1 %v2187_v25 }
  0x1c   :  { %1542 = vmatpush3.bf16.msra.mxu0 %v2193_v26 }
  0x1d   :  { %1564 = vmatpush3.bf16.msra.mxu1 %v2199_v27  ;;  %1543 = vmatprep.subr.bf16.mxu0 %v2205_v28 }
  0x1e   :  { %1565 = vmatprep.subr.bf16.mxu1 %v2211_v29 }
  0x20   :  { %1544 = vmatpush3.bf16.msra.mxu0 %v2217_v30 }
  0x21   :  { %1566 = vmatpush3.bf16.msra.mxu1 %v2223_v31  ;;  %1755 = vmatprep.subr.bf16.mxu0 %v1999_v39 }
  0x22   :  { %1582 = vmatprep.subr.bf16.mxu1 %v2038_v0 }
  0x23   :  { %461 = vmatmul.mubr.bf16.vlgmr.msra.gmra.mrb[0].mxu0 %v158_v51 }
  0x24   :  { %501 = vmatmul.mubr.bf16.vlgmr.msra.gmra.mrb[0].mxu1 %v160_v53  ;;  %1756 = vmatpush3.bf16.msra.mxu0 %v2268_v52 }
  0x25   :  { %1583 = vmatpush3.bf16.msra.mxu1 %v2049_v2  ;;  %1757 = vmatprep.subr.bf16.mxu0 %v1999_v39 }
  0x26   :  { %1584 = vmatprep.subr.bf16.mxu1 %v2061_v4  ;;  %580 = vmatprep.mubr.bf16.mxu1 %v144_v35 }
  0x27   :  { %1771 = vmatprep.mubr.msk.bf16.mxu0 %vm2000_vm0, %v1999_v39 }
  0x28   :  { %1758 = vmatpush3.bf16.msra.mxu0 %v2273_v54 }
  0x29   :  { %1585 = vmatpush3.bf16.msra.mxu1 %v2073_v6  ;;  %1759 = vmatprep.subr.bf16.mxu0 %v1999_v39 }
  0x2a   :  { %1586 = vmatprep.subr.bf16.mxu1 %v2085_v8 }
  0x2c   :  { %1760 = vmatpush3.bf16.msra.mxu0 %v2282_v55 }
  0x2d   :  { %1587 = vmatpush3.bf16.msra.mxu1 %v2097_v10  ;;  %1761 = vmatprep.subr.bf16.mxu0 %v1999_v39 }
  0x2e   :  { %1588 = vmatprep.subr.bf16.mxu1 %v2109_v12 }
  0x2f   :  { %10 = vsyncpa [#allocation3], 0  ;;  %v2304_v57 = vld [vmem:[%s2680_s3 + $0x120] sm:$0xff]   ;;  %v164_v59 = vmul.f32 %v23_v32, %v23_v32  ;;  %v2322_v61 = vld [vmem:[%s2680_s3 + $0x128] sm:$0xff]   ;;  %s2003_s8 = smov 64   ;;  %vm931_vm1 = vcmask 261120  }
  0x30   :  { %1762 = vmatpush3.bf16.msra.mxu0 %v2293_v56  ;;  %v2309_v58 = vld [vmem:[%s2677_s0 + $0x20] sm:$0xff]  ;;  %v2334_v32 = vld [vmem:[%s2680_s3 + $0x130] sm:$0xff]   ;;  %v2345_v42 = vld [vmem:[%s2680_s3 + $0x138] sm:$0xff]   ;;  %s2002_s3 = smov 32   ;;  %vm933_vm2 = vcmask 523264   ;;  %vm1092_vm3 = vcmask 785408  }
  0x31   :  { %1589 = vmatpush3.bf16.msra.mxu1 %v2121_v14  ;;  %1763 = vmatprep.subr.bf16.mxu0 %v1999_v39  ;;  %v2315_v60 = vpack.c.bf16 %v2309_v58, %v2309_v58  ;;  %v2326_v62 = vpack.c.bf16 %v164_v59, %v164_v59  ;;  %s2004_s26 = smov [#allocation2]  }
  0x32   :  { %1590 = vmatprep.subr.bf16.mxu1 %v2133_v16  ;;  %s1445_s27 = sshll.u32 %s2004_s26, 4  ;;  %s1446_s27 = int_to_ptr.vmem [resolvable:$true] %s1445_s27 }
  0x33   :  { %v152_v63 = vunpack.c.l.bf16 %v2315_v60  ;;  %v174_v35 = vunpack.c.l.bf16 %v2326_v62  ;;  %p1980_p1 = scmp.lt.s32.totalorder %s1446_s27, %s1446_s27 }
  0x34   :  { %1764 = vmatpush3.bf16.msra.mxu0 %v2304_v57 }
  0x35   :  { %1591 = vmatpush3.bf16.msra.mxu1 %v2145_v18  ;;  %1765 = vmatprep.subr.bf16.mxu0 %v1999_v39  ;;  %v157_v41 = vsub.f32 %v2309_v58, %v152_v63  ;;  %v179_v43 = vsub.f32 %v164_v59, %v174_v35 }
  0x36   :  { %1592 = vmatprep.subr.bf16.mxu1 %v2157_v20 }
  0x37   :  { %v162_v44 = vpack.c.bf16 %v157_v41, %v157_v41  ;;  %v184_v45 = vpack.c.bf16 %v179_v43, %v179_v43  ;;  %v1927_v43 = vld [vmem:[%s2681_s4] ss:$20 sps:$4 sm:$0xff]  }
  0x38   :  { %1766 = vmatpush3.bf16.msra.mxu0 %v2322_v61 }
  0x39   :  { %1593 = vmatpush3.bf16.msra.mxu1 %v2169_v22  ;;  %1767 = vmatprep.subr.bf16.mxu0 %v1999_v39 }
  0x3a   :  { %1594 = vmatprep.subr.bf16.mxu1 %v2181_v24 }
  0x3c   :  { %1768 = vmatpush3.bf16.msra.mxu0 %v2334_v32 }
  0x3d   :  { %1595 = vmatpush3.bf16.msra.mxu1 %v2193_v26  ;;  %1769 = vmatprep.subr.bf16.mxu0 %v1999_v39 }
  0x3e   :  { %1596 = vmatprep.subr.bf16.mxu1 %v2205_v28 }
  0x40   :  { %1770 = vmatpush3.bf16.msra.mxu0 %v2345_v42 }
  0x41   :  { %1597 = vmatpush3.bf16.msra.mxu1 %v2217_v30  ;;  %1604 = vmatprep.subr.bf16.mxu0 %v2043_v1 }
  0x42   :  { %1635 = vmatprep.subr.bf16.mxu1 %v2038_v0 }
  0x43   :  { %1772 = vmatmul.mubr.bf16.vlgmr.msra.gmra.mrb[4].mxu0 %v162_v44  ;;  %v1929_v44 = vld [vmem:[%s2681_s4 + $0x4] ss:$20 sps:$4 sm:$0xff]  }
  0x44   :  { %581 = vmatmul.mubr.bf16.vlgmr.msra.gmra.mrb[4].mxu1 %v2246_v37  ;;  %1605 = vmatpush3.bf16.msra.mxu0 %v2055_v3  ;;  %v166_v37 = vmul.f32 %v2232_v33, %v2232_v33 }
  0x45   :  { %1636 = vmatpush3.bf16.msra.mxu1 %v2049_v2  ;;  %1606 = vmatprep.subr.bf16.mxu0 %v2067_v5 }
  0x46   :  { %1637 = vmatprep.subr.bf16.mxu1 %v2061_v4  ;;  %620 = vmatprep.mubr.bf16.mxu0 %v2242_v36  ;;  %v163_v36 = vmul.f32 %v2237_v34, %v2237_v34  ;;  %v2381_v34 = vpack.c.bf16 %v166_v37, %v166_v37 }
  0x47   :  { %700 = vmatprep.mubr.bf16.mxu1 %v184_v45  ;;  %v1932_v45 = vld [vmem:[%s2681_s4 + $0x2c] ss:$20 sps:$4 sm:$0xff]  }
  0x48   :  { %1607 = vmatpush3.bf16.msra.mxu0 %v2079_v7  ;;  %v2375_v46 = vpack.c.bf16 %v163_v36, %v163_v36  ;;  %v176_v33 = vunpack.c.l.bf16 %v2381_v34 }
  0x49   :  { %1638 = vmatpush3.bf16.msra.mxu1 %v2073_v6  ;;  %1608 = vmatprep.subr.bf16.mxu0 %v2091_v9 }
  0x4a   :  { %1639 = vmatprep.subr.bf16.mxu1 %v2085_v8  ;;  %v173_v47 = vunpack.c.l.bf16 %v2375_v46  ;;  %v181_v49 = vsub.f32 %v166_v37, %v176_v33  ;;  %v1935_v37 = vld [vmem:[%s2681_s4 + $0x54] ss:$20 sps:$4 sm:$0xff]   ;;  %v1941_v33 = vld [vmem:[%s2681_s4 + $0xa4] ss:$20 sps:$4 sm:$0xff]  }
  0x4c   :  { %1609 = vmatpush3.bf16.msra.mxu0 %v2103_v11  ;;  %v178_v48 = vsub.f32 %v163_v36, %v173_v47  ;;  %v186_v51 = vpack.c.bf16 %v181_v49, %v181_v49  ;;  %v1930_v36 = vld [vmem:[%s2681_s4 + $0x28] ss:$20 sps:$4 sm:$0xff]   ;;  %v1936_v47 = vld [vmem:[%s2681_s4 + $0x78] ss:$20 sps:$4 sm:$0xff]  }
  0x4d   :  { %1640 = vmatpush3.bf16.msra.mxu1 %v2097_v10  ;;  %1610 = vmatprep.subr.bf16.mxu0 %v2115_v13 }
  0x4e   :  { %1641 = vmatprep.subr.bf16.mxu1 %v2109_v12  ;;  %v183_v50 = vpack.c.bf16 %v178_v48, %v178_v48  ;;  %v1939_v48 = vld [vmem:[%s2681_s4 + $0xa0] ss:$20 sps:$4 sm:$0xff]  }
  0x50   :  { %1611 = vmatpush3.bf16.msra.mxu0 %v2127_v15 }
  0x51   :  { %1642 = vmatpush3.bf16.msra.mxu1 %v2121_v14  ;;  %1612 = vmatprep.subr.bf16.mxu0 %v2139_v17 }
  0x52   :  { %1643 = vmatprep.subr.bf16.mxu1 %v2133_v16 }
  0x54   :  { %1613 = vmatpush3.bf16.msra.mxu0 %v2151_v19 }
  0x55   :  { %1644 = vmatpush3.bf16.msra.mxu1 %v2145_v18  ;;  %1614 = vmatprep.subr.bf16.mxu0 %v2163_v21 }
  0x56   :  { %1645 = vmatprep.subr.bf16.mxu1 %v2157_v20 }
  0x58   :  { %1615 = vmatpush3.bf16.msra.mxu0 %v2175_v23 }
  0x59   :  { %1646 = vmatpush3.bf16.msra.mxu1 %v2169_v22  ;;  %1616 = vmatprep.subr.bf16.mxu0 %v2187_v25 }
  0x5a   :  { %1647 = vmatprep.subr.bf16.mxu1 %v2181_v24 }
  0x5c   :  { %1617 = vmatpush3.bf16.msra.mxu0 %v2199_v27 }
  0x5d   :  { %1648 = vmatpush3.bf16.msra.mxu1 %v2193_v26  ;;  %1618 = vmatprep.subr.bf16.mxu0 %v2211_v29 }
  0x5e   :  { %1649 = vmatprep.subr.bf16.mxu1 %v2205_v28 }
  0x60   :  { %1619 = vmatpush3.bf16.msra.mxu0 %v2223_v31 }
  0x61   :  { %1650 = vmatpush3.bf16.msra.mxu1 %v2217_v30  ;;  %1775 = vmatprep.subr.bf16.mxu0 %v1999_v39 }
  0x62   :  { %1657 = vmatprep.subr.bf16.mxu1 %v2043_v1 }
  0x63   :  { %621 = vmatmul.mubr.bf16.vlgmr.msra.gmra.mrb[8].mxu0 %v2256_v40  ;;  %v165_v40 = vmul.f32 %v2251_v38, %v2251_v38 }
  0x64   :  { %701 = vmatmul.mubr.bf16.vlgmr.msra.gmra.mrb[8].mxu1 %v183_v50  ;;  %1776 = vmatpush3.bf16.msra.mxu0 %v2268_v52 }
  0x65   :  { %1658 = vmatpush3.bf16.msra.mxu1 %v2055_v3  ;;  %1777 = vmatprep.subr.bf16.mxu0 %v1999_v39  ;;  %v2418_v53 = vpack.c.bf16 %v165_v40, %v165_v40 }
  0x66   :  { %1659 = vmatprep.subr.bf16.mxu1 %v2067_v5  ;;  %1791 = vmatprep.mubr.msk.bf16.mxu0 %vm2000_vm0, %v1999_v39 }
  0x67   :  { %740 = vmatprep.mubr.bf16.mxu1 %v186_v51  ;;  %v175_v38 = vunpack.c.l.bf16 %v2418_v53 }
  0x68   :  { %1778 = vmatpush3.bf16.msra.mxu0 %v2273_v54 }
  0x69   :  { %1660 = vmatpush3.bf16.msra.mxu1 %v2079_v7  ;;  %1779 = vmatprep.subr.bf16.mxu0 %v1999_v39  ;;  %v180_v59 = vsub.f32 %v165_v40, %v175_v38 }
  0x6a   :  { %1661 = vmatprep.subr.bf16.mxu1 %v2091_v9 }
  0x6b   :  { %v185_v63 = vpack.c.bf16 %v180_v59, %v180_v59 }
  0x6c   :  { %1780 = vmatpush3.bf16.msra.mxu0 %v2282_v55 }
  0x6d   :  { %1662 = vmatpush3.bf16.msra.mxu1 %v2103_v11  ;;  %1781 = vmatprep.subr.bf16.mxu0 %v1999_v39 }
  0x6e   :  { %1663 = vmatprep.subr.bf16.mxu1 %v2115_v13 }
  0x70   :  { %1782 = vmatpush3.bf16.msra.mxu0 %v2293_v56 }
  0x71   :  { %1664 = vmatpush3.bf16.msra.mxu1 %v2127_v15  ;;  %1783 = vmatprep.subr.bf16.mxu0 %v1999_v39 }
  0x72   :  { %1665 = vmatprep.subr.bf16.mxu1 %v2139_v17 }
  0x74   :  { %1784 = vmatpush3.bf16.msra.mxu0 %v2304_v57 }
  0x75   :  { %1666 = vmatpush3.bf16.msra.mxu1 %v2151_v19  ;;  %1785 = vmatprep.subr.bf16.mxu0 %v1999_v39 }
  0x76   :  { %1667 = vmatprep.subr.bf16.mxu1 %v2163_v21 }
  0x78   :  { %1786 = vmatpush3.bf16.msra.mxu0 %v2322_v61 }
  0x79   :  { %1668 = vmatpush3.bf16.msra.mxu1 %v2175_v23  ;;  %1787 = vmatprep.subr.bf16.mxu0 %v1999_v39 }
  0x7a   :  { %1669 = vmatprep.subr.bf16.mxu1 %v2187_v25 }
  0x7c   :  { %1788 = vmatpush3.bf16.msra.mxu0 %v2334_v32 }
  0x7d   :  { %1670 = vmatpush3.bf16.msra.mxu1 %v2199_v27  ;;  %1789 = vmatprep.subr.bf16.mxu0 %v1999_v39 }
  0x7e   :  { %1671 = vmatprep.subr.bf16.mxu1 %v2211_v29 }
  0x80   :  { %1790 = vmatpush3.bf16.msra.mxu0 %v2345_v42 }
  0x81   :  { %1672 = vmatpush3.bf16.msra.mxu1 %v2223_v31  ;;  %1795 = vmatprep.subr.bf16.mxu0 %v1999_v39 }
  0x82   :  { %1688 = vmatprep.subr.bf16.mxu1 %v2038_v0  ;;  %v167_v0 = vmul.f32 %v2309_v58, %v2309_v58 }
  0x83   :  { %1792 = vmatmul.mubr.bf16.vlgmr.msra.gmra.mrb[4].mxu0 %v2315_v60 }
  0x84   :  { %741 = vmatmul.mubr.bf16.vlgmr.msra.gmra.mrb[12].mxu1 %v185_v63  ;;  %1796 = vmatpush3.bf16.msra.mxu0 %v2268_v52 }
  0x85   :  { %1689 = vmatpush3.bf16.msra.mxu1 %v2049_v2  ;;  %1797 = vmatprep.subr.bf16.mxu0 %v1999_v39  ;;  %v172_v2 = vpack.c.bf16 %v167_v0, %v167_v0 }
  0x86   :  { %1690 = vmatprep.subr.bf16.mxu1 %v2061_v4  ;;  %820 = vmatprep.mubr.bf16.mxu1 %v2326_v62 }
  0x87   :  { %1811 = vmatprep.mubr.msk.bf16.mxu0 %vm2000_vm0, %v1999_v39  ;;  %v177_v4 = vunpack.c.l.bf16 %v172_v2 }
  0x88   :  { %1798 = vmatpush3.bf16.msra.mxu0 %v2273_v54 }
  0x89   :  { %1691 = vmatpush3.bf16.msra.mxu1 %v2073_v6  ;;  %1799 = vmatprep.subr.bf16.mxu0 %v1999_v39  ;;  %v182_v6 = vsub.f32 %v167_v0, %v177_v4 }
  0x8a   :  { %1692 = vmatprep.subr.bf16.mxu1 %v2085_v8 }
  0x8b   :  { %v187_v8 = vpack.c.bf16 %v182_v6, %v182_v6 }
  0x8c   :  { %1800 = vmatpush3.bf16.msra.mxu0 %v2282_v55 }
  0x8d   :  { %1693 = vmatpush3.bf16.msra.mxu1 %v2097_v10  ;;  %1801 = vmatprep.subr.bf16.mxu0 %v1999_v39 }
  0x8e   :  { %1694 = vmatprep.subr.bf16.mxu1 %v2109_v12 }
  0x90   :  { %1802 = vmatpush3.bf16.msra.mxu0 %v2293_v56 }
  0x91   :  { %1695 = vmatpush3.bf16.msra.mxu1 %v2121_v14  ;;  %1803 = vmatprep.subr.bf16.mxu0 %v1999_v39 }
  0x92   :  { %1696 = vmatprep.subr.bf16.mxu1 %v2133_v16 }
  0x94   :  { %1804 = vmatpush3.bf16.msra.mxu0 %v2304_v57 }
  0x95   :  { %1697 = vmatpush3.bf16.msra.mxu1 %v2145_v18  ;;  %1805 = vmatprep.subr.bf16.mxu0 %v1999_v39 }
  0x96   :  { %1698 = vmatprep.subr.bf16.mxu1 %v2157_v20 }
  0x98   :  { %1806 = vmatpush3.bf16.msra.mxu0 %v2322_v61 }
  0x99   :  { %1699 = vmatpush3.bf16.msra.mxu1 %v2169_v22  ;;  %1807 = vmatprep.subr.bf16.mxu0 %v1999_v39 }
  0x9a   :  { %1700 = vmatprep.subr.bf16.mxu1 %v2181_v24 }
  0x9c   :  { %1808 = vmatpush3.bf16.msra.mxu0 %v2334_v32 }
  0x9d   :  { %1701 = vmatpush3.bf16.msra.mxu1 %v2193_v26  ;;  %1809 = vmatprep.subr.bf16.mxu0 %v1999_v39 }
  0x9e   :  { %1702 = vmatprep.subr.bf16.mxu1 %v2205_v28 }
  0xa0   :  { %1810 = vmatpush3.bf16.msra.mxu0 %v2345_v42 }
  0xa1   :  { %1703 = vmatpush3.bf16.msra.mxu1 %v2217_v30  ;;  %1710 = vmatprep.subr.bf16.mxu0 %v2043_v1 }
  0xa2   :  { %1096 = vmatprep.subr.bf16.mxu1 %v1929_v44 }
  0xa3   :  { %1812 = vmatmul.mubr.bf16.vlgmr.msra.gmra.mrb[12].mxu0 %v187_v8 }
  0xa4   :  { %821 = vmatmul.mubr.bf16.vlgmr.msra.gmra.mrb[16].mxu1 %v2375_v46  ;;  %1711 = vmatpush3.bf16.msra.mxu0 %v2055_v3  ;;  %v1933_v46 = vld [vmem:[%s2681_s4 + $0x50] ss:$20 sps:$4 sm:$0xff]  }
  0xa5   :  { %860 = vmatprep.mubr.bf16.mxu0 %v2381_v34  ;;  %1712 = vmatprep.subr.bf16.mxu0 %v2067_v5  ;;  %v1938_v34 = vld [vmem:[%s2681_s4 + $0x7c] ss:$20 sps:$4 sm:$0xff]  }
  0xa6   :  { %1097 = vmatpush1.bf16.msra.mxu1 %v1927_v43 }
  0xa7   :  { %1098 = vmatprep.subr.bf16.mxu1 %v1932_v45 }
  0xa8   :  { %1713 = vmatpush3.bf16.msra.mxu0 %v2079_v7 }
  0xa9   :  { %1714 = vmatprep.subr.bf16.mxu0 %v2091_v9 }
  0xaa   :  { %1099 = vmatpush1.bf16.msra.mxu1 %v1930_v36 }
  0xab   :  { %1100 = vmatprep.subr.bf16.mxu1 %v1935_v37 }
  0xac   :  { %1715 = vmatpush3.bf16.msra.mxu0 %v2103_v11 }
  0xad   :  { %1716 = vmatprep.subr.bf16.mxu0 %v2115_v13 }
  0xae   :  { %1101 = vmatpush1.bf16.msra.mxu1 %v1933_v46 }
  0xaf   :  { %1102 = vmatprep.subr.bf16.mxu1 %v1938_v34 }
  0xb0   :  { %1717 = vmatpush3.bf16.msra.mxu0 %v2127_v15 }
  0xb1   :  { %1718 = vmatprep.subr.bf16.mxu0 %v2139_v17 }
  0xb2   :  { %1103 = vmatpush1.bf16.msra.mxu1 %v1936_v47 }
  0xb3   :  { %1104 = vmatprep.subr.bf16.mxu1 %v1941_v33 }
  0xb4   :  { %1719 = vmatpush3.bf16.msra.mxu0 %v2151_v19 }
  0xb5   :  { %1720 = vmatprep.subr.bf16.mxu0 %v2163_v21 }
  0xb6   :  { %1105 = vmatpush1.bf16.msra.mxu1 %v1939_v48 }
  0xb8   :  { %1721 = vmatpush3.bf16.msra.mxu0 %v2175_v23 }
  0xb9   :  { %1722 = vmatprep.subr.bf16.mxu0 %v2187_v25 }
  0xbc   :  { %1723 = vmatpush3.bf16.msra.mxu0 %v2199_v27 }
  0xbd   :  { %1724 = vmatprep.subr.bf16.mxu0 %v2211_v29 }
  0xc0   :  { %1725 = vmatpush3.bf16.msra.mxu0 %v2223_v31 }
  0xc1   :  { %1815 = vmatprep.subr.bf16.mxu0 %v1999_v39 }
  0xc3   :  { %861 = vmatmul.mubr.bf16.vlgmr.msra.gmra.mrb[16].mxu0 %v2418_v53 }
  0xc4   :  { %1816 = vmatpush3.bf16.msra.mxu0 %v2268_v52  ;;  %1831 = vmatprep.mubr.msk.bf16.mxu0 %vm2000_vm0, %v1999_v39 }
  0xc5   :  { %1817 = vmatprep.subr.bf16.mxu0 %v1999_v39 }
  0xc8   :  { %1818 = vmatpush3.bf16.msra.mxu0 %v2273_v54 }
  0xc9   :  { %1819 = vmatprep.subr.bf16.mxu0 %v1999_v39 }
  0xcc   :  { %1820 = vmatpush3.bf16.msra.mxu0 %v2282_v55 }
  0xcd   :  { %1821 = vmatprep.subr.bf16.mxu0 %v1999_v39 }
  0xd0   :  { %1822 = vmatpush3.bf16.msra.mxu0 %v2293_v56 }
  0xd1   :  { %1823 = vmatprep.subr.bf16.mxu0 %v1999_v39 }
  0xd4   :  { %1824 = vmatpush3.bf16.msra.mxu0 %v2304_v57 }
  0xd5   :  { %1825 = vmatprep.subr.bf16.mxu0 %v1999_v39 }
  0xd8   :  { %1826 = vmatpush3.bf16.msra.mxu0 %v2322_v61 }
  0xd9   :  { %1827 = vmatprep.subr.bf16.mxu0 %v1999_v39 }
  0xdc   :  { %1828 = vmatpush3.bf16.msra.mxu0 %v2334_v32 }
  0xdd   :  { %1829 = vmatprep.subr.bf16.mxu0 %v1999_v39 }
  0xe0   :  { %1830 = vmatpush3.bf16.msra.mxu0 %v2345_v42 }
  0xe1   :  { %1238 = vmatprep.subr.bf16.mxu0 %v1929_v44  ;;  %v1948_v44 = vld [vmem:[%s2681_s4 + $0x10] ss:$20 sps:$4 sm:$0xff]  }
  0xe3   :  { %1832 = vmatmul.mubr.bf16.vlgmr.msra.gmra.mrb[12].mxu0 %v172_v2 }
  0xe4   :  { %1239 = vmatpush1.bf16.msra.mxu0 %v1927_v43 }
  0xe5   :  { %1240 = vmatprep.subr.bf16.mxu0 %v1932_v45 }
  0xe8   :  { %1241 = vmatpush1.bf16.msra.mxu0 %v1930_v36  ;;  %v1949_v36 = vld [vmem:[%s2681_s4 + $0x30] ss:$20 sps:$4 sm:$0xff]  }
  0xe9   :  { %1242 = vmatprep.subr.bf16.mxu0 %v1935_v37  ;;  %v1955_v37 = vld [vmem:[%s2681_s4 + $0x5c] ss:$20 sps:$4 sm:$0xff]  }
  0xec   :  { %1243 = vmatpush1.bf16.msra.mxu0 %v1933_v46  ;;  %v1952_v46 = vld [vmem:[%s2681_s4 + $0x38] ss:$20 sps:$4 sm:$0xff]  }
  0xed   :  { %1244 = vmatprep.subr.bf16.mxu0 %v1938_v34  ;;  %v1953_v34 = vld [vmem:[%s2681_s4 + $0x58] ss:$20 sps:$4 sm:$0xff]  }
  0xf0   :  { %1245 = vmatpush1.bf16.msra.mxu0 %v1936_v47  ;;  %v1959_v47 = vld [vmem:[%s2681_s4 + $0x84] ss:$20 sps:$4 sm:$0xff]  }
  0xf1   :  { %1246 = vmatprep.subr.bf16.mxu0 %v1941_v33  ;;  %v1956_v33 = vld [vmem:[%s2681_s4 + $0x60] ss:$20 sps:$4 sm:$0xff]  }
  0xf4   :  { %1247 = vmatpush1.bf16.msra.mxu0 %v1939_v48  ;;  %v1957_v48 = vld [vmem:[%s2681_s4 + $0x80] ss:$20 sps:$4 sm:$0xff]  }
  0xf6   :  { %v1545_v1 = vpop.f32.mrb[0].mxu0 }
  0xf7   :  { %v1567_v3 = vpop.f32.mrb[0].mxu1  ;;  %v1546_v5 = vpop.f32.mrb[1].mxu0 }
  0xf8   :  { %v1568_v7 = vpop.f32.mrb[1].mxu1  ;;  %v1547_v9 = vadd.f32 %v1546_v5, %v1545_v1  ;;  %v1548_v11 = vpop.f32.mrb[2].mxu0 }
  0xf9   :  { %v1569_v10 = vadd.f32 %v1568_v7, %v1567_v3  ;;  %v1570_v12 = vpop.f32.mrb[2].mxu1  ;;  %v1549_v13 = vpop.f32.mrb[3].mxu0 }
  0xfa   :  { %v1571_v14 = vpop.f32.mrb[3].mxu1 }
  0xfb   :  { %v503_v15 = vadd.f32 %v1569_v10, %v1547_v9 }
 0x117   :  { %v1598_v16 = vpop.f32.mrb[4].mxu1 }
 0x118   :  { %v1599_v17 = vpop.f32.mrb[5].mxu1 }
 0x119   :  { %v1600_v18 = vadd.f32 %v1599_v17, %v1598_v16  ;;  %v1601_v19 = vpop.f32.mrb[6].mxu1  ;;  %v1942_v17 = vld [vmem:[%s2681_s4 + $0xc8] ss:$20 sps:$4 sm:$0xff]  }
 0x11a   :  { %v1602_v20 = vpop.f32.mrb[7].mxu1 }
 0x11b   :  { %v1867_v21 = vadd.f32 %v1600_v18, %v503_v15  ;;  %v1944_v15 = vld [vmem:[%s2681_s4 + $0xcc] ss:$20 sps:$4 sm:$0xff]  }
 0x11c   :  { %1106 = vmatprep.subr.bf16.mxu1 %v1944_v15  ;;  %1248 = vmatprep.subr.bf16.mxu0 %v1944_v15 }
 0x11d   :  { %1107 = vmatpush1.bf16.msra.mxu1 %v1942_v17  ;;  %1249 = vmatpush1.bf16.msra.mxu0 %v1942_v17 }
 0x11e   :  { %1851 = vmatprep.subr.bf16.mxu0 %v1999_v39 }
 0x136   :  { %v1620_v22 = vpop.f32.mrb[8].mxu0 }
 0x137   :  { %v1651_v23 = vpop.f32.mrb[8].mxu1  ;;  %v1621_v24 = vpop.f32.mrb[9].mxu0 }
 0x138   :  { %v1652_v25 = vpop.f32.mrb[9].mxu1  ;;  %v1622_v26 = vadd.f32 %v1621_v24, %v1620_v22  ;;  %v1623_v27 = vpop.f32.mrb[10].mxu0  ;;  %v2001_v24 = vmov 0  }
 0x139   :  { %v1653_v28 = vadd.f32 %v1652_v25, %v1651_v23  ;;  %v1654_v29 = vpop.f32.mrb[10].mxu1  ;;  %v1624_v30 = vpop.f32.mrb[11].mxu0  ;;  %1128 = vmatprep.mubr.bf16.mxu1 %v2001_v24  ;;  %1270 = vmatprep.mubr.bf16.mxu0 %v2001_v24 }
 0x13a   :  { %v1655_v31 = vpop.f32.mrb[11].mxu1  ;;  %v1868_v52 = vadd.f32 %v1867_v21, %v1622_v26  ;;  %v2549_v21 = vld [vmem:[%s2681_s4 + $0xc] ss:$20 sps:$4 sm:$0xff]  }
 0x13b   :  { %1137 = vmatprep.subr.bf16.mxu1 %v2549_v21 }
 0x156   :  { %v662_v54 = vpop.f32.mrb[4].mxu0 }
 0x157   :  { %v1673_v55 = vpop.f32.mrb[12].mxu1  ;;  %v1869_v56 = vadd.f32 %v1868_v52, %v662_v54  ;;  %v1793_v57 = vpop.f32.mrb[5].mxu0 }
 0x158   :  { %v1674_v60 = vpop.f32.mrb[13].mxu1  ;;  %v665_v61 = vpop.f32.mrb[6].mxu0 }
 0x159   :  { %v1675_v62 = vadd.f32 %v1674_v60, %v1673_v55  ;;  %v1676_v32 = vpop.f32.mrb[14].mxu1  ;;  %v1794_v35 = vpop.f32.mrb[7].mxu0  ;;  %v908_v8 = vmul.f32 0.05, %v1869_v56 }
 0x15a   :  { %v1677_v41 = vpop.f32.mrb[15].mxu1 }
 0x15b   :  { %v743_v42 = vadd.f32 %v1675_v62, %v1653_v28  ;;  %v910_v9 = vmul.f32 %v908_v8, %v908_v8  ;;  %v915_v16 = vsub.f32 0.0, %v908_v8  ;;  %v2558_v62 = vld [vmem:[%s2681_s4 + $0x8] ss:$20 sps:$4 sm:$0xff]   ;;  %v1402_v8 = vld [vmem:[%s2679_s2] sm:$0x1f] }
 0x177   :  { %v1704_v49 = vpop.f32.mrb[16].mxu1 }
 0x178   :  { %v1705_v50 = vpop.f32.mrb[17].mxu1 }
 0x179   :  { %v1706_v51 = vadd.f32 %v1705_v50, %v1704_v49  ;;  %v1707_v40 = vpop.f32.mrb[18].mxu1  ;;  %v1963_v49 = vld [vmem:[%s2681_s4 + $0xac] ss:$20 sps:$4 sm:$0xff]   ;;  %v1960_v50 = vld [vmem:[%s2681_s4 + $0x88] ss:$20 sps:$4 sm:$0xff]  }
 0x17a   :  { %v1708_v53 = vpop.f32.mrb[19].mxu1  ;;  %v1967_v40 = vld [vmem:[%s2681_s4 + $0xd4] ss:$20 sps:$4 sm:$0xff]  }
 0x17b   :  { %v1870_v38 = vadd.f32 %v1706_v51, %v743_v42  ;;  %v1951_v42 = vld [vmem:[%s2681_s4 + $0x34] ss:$20 sps:$4 sm:$0xff]   ;;  %v1964_v53 = vld [vmem:[%s2681_s4 + $0xb0] ss:$20 sps:$4 sm:$0xff]  }
 0x17c   :  { %v1961_v51 = vld [vmem:[%s2681_s4 + $0xa8] ss:$20 sps:$4 sm:$0xff]  }
 0x196   :  { %v1726_v59 = vpop.f32.mrb[16].mxu0 }
 0x197   :  { %v1727_v63 = vpop.f32.mrb[17].mxu0 }
 0x198   :  { %v1728_v0 = vadd.f32 %v1727_v63, %v1726_v59  ;;  %v1729_v2 = vpop.f32.mrb[18].mxu0  ;;  %v1968_v59 = vld [vmem:[%s2681_s4 + $0xd8] ss:$20 sps:$4 sm:$0xff]  }
 0x199   :  { %v1730_v4 = vpop.f32.mrb[19].mxu0  ;;  %v1370_v2 = vld [vmem:[%s2678_s1] sm:$0x1f] }
 0x19a   :  { %v1871_v6 = vadd.f32 %v1870_v38, %v1728_v0  ;;  %v1965_v38 = vld [vmem:[%s2681_s4 + $0xd0] ss:$20 sps:$4 sm:$0xff]  }
 0x1b6   :  { %v902_v1 = vpop.f32.mrb[12].mxu0 }
 0x1b7   :  { %v1872_v3 = vadd.f32 %v1871_v6, %v902_v1  ;;  %v1833_v5 = vpop.f32.mrb[13].mxu0  ;;  %v1971_v1 = vld [vmem:[%s2677_s0] sm:$0xff] }
 0x1b8   :  { %v905_v7 = vpop.f32.mrb[14].mxu0 }
 0x1b9   :  { %v909_v10 = vmul.f32 0.05, %v1872_v3  ;;  %v1834_v11 = vpop.f32.mrb[15].mxu0 }
 0x1bb   :  { %v911_v12 = vsub.f32 %v909_v10, %v910_v9  ;;  %v1972_v9 = vld [vmem:[%s2677_s0 + $0x8] sm:$0xff] }
 0x1bd   :  { %v912_v13 = vmax.f32 %v911_v12, 0.0 }
 0x1bf   :  { %v913_v14 = vadd.f32 1e-05, %v912_v13 }
 0x1c1   :  { %1969 = vrsqrt.f32 %v913_v14 }
 0x1cb   :  { %v1970_v18 = vpop.eup %1969 }
 0x1cc   :  { %v917_v19 = vpack.c.bf16 %v1970_v18, %v1970_v18  ;;  %v916_v20 = vmul.f32 %v1970_v18, %v915_v16 }
 0x1ce   :  { %v918_v22 = vunpack.c.l.bf16 %v917_v19  ;;  %v1218_v23 = vpack.c.bf16 %v916_v20, %v916_v20 }
 0x1d0   :  { %v919_v25 = vsub.f32 %v1970_v18, %v918_v22  ;;  %v1219_v26 = vunpack.c.l.bf16 %v1218_v23 }
 0x1d2   :  { %v920_v27 = vpack.c.bf16 %v919_v25, %v919_v25  ;;  %v1220_v28 = vsub.f32 %v916_v20, %v1219_v26 }
 0x1d4   :  { %v921_v29 = vunpack.c.l.bf16 %v920_v27  ;;  %v1221_v30 = vpack.c.bf16 %v1220_v28, %v1220_v28 }
 0x1d6   :  { %924 = vrot.lane.b32.xlu0 %v921_v29, %s2002_s3  ;;  %v1222_v31 = vunpack.c.l.bf16 %v1221_v30  ;;  %v922_v52 = vsub.f32 %v919_v25, %v921_v29 }
 0x1d8   :  { %1225 = vrot.lane.b32.xlu1 %v1222_v31, %s2002_s3  ;;  %v1223_v54 = vsub.f32 %v1220_v28, %v1222_v31 }
 0x1da   :  { %928 = vrot.lane.b32.xlu0 %v922_v52, %s2003_s8 }
 0x1dc   :  { %1229 = vrot.lane.b32.xlu1 %v1223_v54, %s2003_s8 }
 0x248   :  { %v925_v55 = vpop.permute.xlu0 %924 }
 0x249   :  { %v932_v57 = vsel %vm931_vm1, %v918_v22, %v925_v55 }
 0x24a   :  { %v1226_v56 = vpop.permute.xlu1 %1225 }
 0x24b   :  { %v1232_v32 = vsel %vm931_vm1, %v1219_v26, %v1226_v56 }
 0x24c   :  { %v929_v60 = vpop.permute.xlu0 %928 }
 0x24d   :  { %v934_v61 = vsel %vm933_vm2, %v932_v57, %v929_v60 }
 0x24e   :  { %v935_v35 = vpack.c.bf16 %v934_v61, %v934_v61  ;;  %v1230_v41 = vpop.permute.xlu1 %1229 }
 0x24f   :  { %v1233_v43 = vsel %vm933_vm2, %v1232_v32, %v1230_v41 }
 0x250   :  { %v2566_v45 = vpack.c.bf16 %v1233_v43, %v1233_v43  ;;  %1523 = vmatmul.mubr.msk.bf16.vlgmr.msra.gmra.mrb[20].mxu1 %vm1092_vm3, %v935_v35 }
 0x251   :  { %1138 = vmatpush1.bf16.msra.mxu1 %v2558_v62  ;;  %1169 = vmatprep.mubr.bf16.mxu1 %v2001_v24 }
 0x252   :  { %1526 = vmatmul.mubr.msk.bf16.vlgmr.msra.gmra.mrb[20].mxu0 %vm1092_vm3, %v2566_v45  ;;  %1139 = vmatprep.subr.bf16.mxu1 %v1951_v42 }
 0x253   :  { %1852 = vmatpush3.bf16.msra.mxu0 %v1948_v44  ;;  %1863 = vmatprep.mubr.msk.bf16.mxu0 %vm2000_vm0, %v1999_v39 }
 0x254   :  { %1853 = vmatprep.subr.bf16.mxu0 %v1999_v39 }
 0x255   :  { %1140 = vmatpush1.bf16.msra.mxu1 %v1949_v36 }
 0x256   :  { %1141 = vmatprep.subr.bf16.mxu1 %v1955_v37 }
 0x257   :  { %1854 = vmatpush3.bf16.msra.mxu0 %v1952_v46 }
 0x258   :  { %1855 = vmatprep.subr.bf16.mxu0 %v1999_v39 }
 0x259   :  { %1142 = vmatpush1.bf16.msra.mxu1 %v1953_v34 }
 0x25a   :  { %1143 = vmatprep.subr.bf16.mxu1 %v1959_v47 }
 0x25b   :  { %1856 = vmatpush3.bf16.msra.mxu0 %v1956_v33 }
 0x25c   :  { %1857 = vmatprep.subr.bf16.mxu0 %v1999_v39 }
 0x25d   :  { %1144 = vmatpush1.bf16.msra.mxu1 %v1957_v48 }
 0x25e   :  { %1145 = vmatprep.subr.bf16.mxu1 %v1963_v49 }
 0x25f   :  { %1858 = vmatpush3.bf16.msra.mxu0 %v1960_v50 }
 0x260   :  { %1859 = vmatprep.subr.bf16.mxu0 %v1999_v39 }
 0x261   :  { %1146 = vmatpush1.bf16.msra.mxu1 %v1961_v51 }
 0x262   :  { %1147 = vmatprep.subr.bf16.mxu1 %v1967_v40 }
 0x263   :  { %1860 = vmatpush3.bf16.msra.mxu0 %v1964_v53 }
 0x264   :  { %1861 = vmatprep.subr.bf16.mxu0 %v1999_v39 }
 0x265   :  { %1148 = vmatpush1.bf16.msra.mxu1 %v1965_v38 }
 0x266   :  { %1835 = vmatprep.subr.bf16.mxu1 %v1999_v39 }
 0x267   :  { %1862 = vmatpush3.bf16.msra.mxu0 %v1968_v59 }
 0x268   :  { %1524 = vmatmul.mubr.msk.bf16.vlgmr.msra.gmra.mrb[24].mxu1 %vm1092_vm3, %v935_v35 }
 0x269   :  { %1836 = vmatpush3.bf16.msra.mxu1 %v1948_v44  ;;  %1847 = vmatprep.mubr.msk.bf16.mxu1 %vm2000_vm0, %v1999_v39 }
 0x26a   :  { %1864 = vmatmul.mubr.msk.bf16.vlgmr.msra.gmra.mrb[24].mxu0 %vm1092_vm3, %v2566_v45  ;;  %1837 = vmatprep.subr.bf16.mxu1 %v1999_v39 }
 0x26d   :  { %1838 = vmatpush3.bf16.msra.mxu1 %v1952_v46 }
 0x26e   :  { %1839 = vmatprep.subr.bf16.mxu1 %v1999_v39 }
 0x271   :  { %1840 = vmatpush3.bf16.msra.mxu1 %v1956_v33 }
 0x272   :  { %1841 = vmatprep.subr.bf16.mxu1 %v1999_v39 }
 0x275   :  { %1842 = vmatpush3.bf16.msra.mxu1 %v1960_v50 }
 0x276   :  { %1843 = vmatprep.subr.bf16.mxu1 %v1999_v39 }
 0x279   :  { %1844 = vmatpush3.bf16.msra.mxu1 %v1964_v53 }
 0x27a   :  { %1845 = vmatprep.subr.bf16.mxu1 %v1999_v39  ;;  %v1372_v39 = vlaneseq }
 0x27c   :  { %v2639_v63 = vshrl.u32 %v1372_v39, 7 }
 0x27d   :  { %1846 = vmatpush3.bf16.msra.mxu1 %v1968_v59 }
 0x27e   :  { %1279 = vmatprep.subr.bf16.mxu1 %v2549_v21  ;;  %v1374_v0 = vsub.s32 0, %v2639_v63  ;;  %v1378_v4 = vsub.s32 1, %v2639_v63  ;;  %v1390_v55 = vsub.s32 4, %v2639_v63  ;;  %v1382_v44 = vsub.s32 2, %v2639_v63 }
 0x280   :  { %1848 = vmatmul.mubr.msk.bf16.vlgmr.msra.gmra.mrb[28].mxu1 %vm1092_vm3, %v935_v35  ;;  %v1375_v7 = vrot.slane %v1370_v2, %v1374_v0  ;;  %v1379_v13 = vrot.slane %v1370_v2, %v1378_v4  ;;  %v1407_v15 = vrot.slane %v1402_v8, %v1374_v0  ;;  %v1411_v19 = vrot.slane %v1402_v8, %v1378_v4 }
 0x281   :  { %1280 = vmatpush1.bf16.msra.mxu1 %v2558_v62  ;;  %1311 = vmatprep.mubr.bf16.mxu1 %v2001_v24  ;;  %v1391_v60 = vrot.slane %v1370_v2, %v1390_v55  ;;  %v1423_v35 = vrot.slane %v1402_v8, %v1390_v55  ;;  %v1383_v46 = vrot.slane %v1370_v2, %v1382_v44 }
 0x282   :  { %1281 = vmatprep.subr.bf16.mxu1 %v1951_v42 }
 0x285   :  { %1282 = vmatpush1.bf16.msra.mxu1 %v1949_v36  ;;  %v1973_v36 = vld [vmem:[%s2677_s0 + $0x10] sm:$0xff] }
 0x286   :  { %1283 = vmatprep.subr.bf16.mxu1 %v1955_v37 }
 0x289   :  { %1284 = vmatpush1.bf16.msra.mxu1 %v1953_v34 }
 0x28a   :  { %1285 = vmatprep.subr.bf16.mxu1 %v1959_v47 }
 0x28d   :  { %1286 = vmatpush1.bf16.msra.mxu1 %v1957_v48 }
 0x28e   :  { %1287 = vmatprep.subr.bf16.mxu1 %v1963_v49  ;;  %v1415_v49 = vrot.slane %v1402_v8, %v1382_v44 }
 0x291   :  { %1288 = vmatpush1.bf16.msra.mxu1 %v1961_v51 }
 0x292   :  { %1289 = vmatprep.subr.bf16.mxu1 %v1967_v40 }
 0x295   :  { %1290 = vmatpush1.bf16.msra.mxu1 %v1965_v38 }
 0x298   :  { %1527 = vmatmul.mubr.msk.bf16.vlgmr.msra.gmra.mrb[32].mxu1 %vm1092_vm3, %v2566_v45  ;;  %v1386_v45 = vsub.s32 3, %v2639_v63 }
 0x29a   :  { %v1387_v33 = vrot.slane %v1370_v2, %v1386_v45  ;;  %v1419_v40 = vrot.slane %v1402_v8, %v1386_v45 }
 0x323   :  { %v1130_v6 = vpop.f32.mrb[20].mxu1 }
 0x324   :  { %v1360_v3 = vmul.f32 %v1971_v1, %v1130_v6  ;;  %v1132_v5 = vpop.f32.mrb[21].mxu1 }
 0x325   :  { %v1361_v10 = vmul.f32 %v1972_v9, %v1132_v5  ;;  %v1134_v11 = vpop.f32.mrb[22].mxu1  ;;  %v1272_v12 = vpop.f32.mrb[20].mxu0 }
 0x326   :  { %v1365_v14 = vadd.f32 %v1360_v3, %v1272_v12  ;;  %v1135_v16 = vpop.f32.mrb[23].mxu1  ;;  %v1274_v17 = vpop.f32.mrb[21].mxu0 }
 0x327   :  { %v1366_v18 = vadd.f32 %v1361_v10, %v1274_v17  ;;  %v1276_v20 = vpop.f32.mrb[22].mxu0 }
 0x328   :  { %v1397_v21 = vmul.f32 %v1375_v7, %v1365_v14  ;;  %v1277_v22 = vpop.f32.mrb[23].mxu0 }
 0x329   :  { %v1398_v23 = vmul.f32 %v1379_v13, %v1366_v18 }
 0x32a   :  { %v1429_v24 = vadd.f32 %v1407_v15, %v1397_v21 }
 0x32b   :  { %v1430_v25 = vadd.f32 %v1411_v19, %v1398_v23 }
 0x32c   :  { %1434 = vst [vmem:[#allocation2] sm:$0xff] %v1429_v24 }
 0x32d   :  { %1435 = vst [vmem:[#allocation2 + $0x8] sm:$0xff] %v1430_v25 }
 0x33b   :  { %v1171_v26 = vpop.f32.mrb[24].mxu1 }
 0x33c   :  { %v1173_v27 = vpop.f32.mrb[25].mxu1  ;;  %v1362_v37 = vmul.f32 %v1973_v36, %v1171_v26 }
 0x33d   :  { %v1175_v28 = vpop.f32.mrb[26].mxu1  ;;  %v1354_v29 = vpop.f32.mrb[24].mxu0 }
 0x33e   :  { %v1176_v30 = vpop.f32.mrb[27].mxu1  ;;  %v1865_v31 = vpop.f32.mrb[25].mxu0 }
 0x33f   :  { %v1357_v52 = vpop.f32.mrb[26].mxu0 }
 0x340   :  { %v1866_v54 = vpop.f32.mrb[27].mxu0 }
 0x353   :  { %v1212_v56 = vpop.f32.mrb[28].mxu1 }
 0x354   :  { %v1364_v57 = vmul.f32 %v1212_v56, %v2309_v58  ;;  %v1849_v61 = vpop.f32.mrb[29].mxu1  ;;  %v1974_v58 = vld [vmem:[%s2677_s0 + $0x18] sm:$0xff]  ;;  %s1975_s0 = scalar_lea.vmem %s1446_s27, 640 }
 0x355   :  { %v1215_v62 = vpop.f32.mrb[30].mxu1  ;;  %v1363_v34 = vmul.f32 %v1974_v58, %v1173_v27  ;;  %p1976_p0 = scmp.ne.s32.totalorder %s1446_s27, %s1975_s0  ;;  %p1981_p2 = scmp.lt.s32.totalorder %s1975_s0, %s1975_s0 }
 0x356   :  { %v1369_v32 = vadd.f32 %v1364_v57, %v1354_v29  ;;  %v1850_v41 = vpop.f32.mrb[31].mxu1 }
 0x357   :  { %p1982_p3 = por %p1981_p2, %p1980_p1 }
 0x358   :  { %v1401_v42 = vmul.f32 %v1391_v60, %v1369_v32 }
 0x359   :  { %p1983_p4 = pnand %p1982_p3, %p1976_p0 }
 0x35a   :  { %v1433_v43 = vadd.f32 %v1423_v35, %v1401_v42 }
 0x35c   :  { %1438 = vst [vmem:[#allocation2 + $0x20] sm:$0xff] %v1433_v43 }
 0x36b   :  { %v1313_v47 = vpop.f32.mrb[32].mxu1 }
 0x36c   :  { %v1367_v48 = vadd.f32 %v1362_v37, %v1313_v47  ;;  %v1315_v50 = vpop.f32.mrb[33].mxu1 }
 0x36d   :  { %v1368_v51 = vadd.f32 %v1363_v34, %v1315_v50  ;;  %v1317_v53 = vpop.f32.mrb[34].mxu1 }
 0x36e   :  { %v1399_v38 = vmul.f32 %v1383_v46, %v1367_v48  ;;  %v1318_v59 = vpop.f32.mrb[35].mxu1 }
 0x36f   :  { %v1400_v39 = vmul.f32 %v1387_v33, %v1368_v51 }
 0x370   :  { %v1431_v63 = vadd.f32 %v1415_v49, %v1399_v38 }
 0x371   :  { %v1432_v0 = vadd.f32 %v1419_v40, %v1400_v39 }
 0x372   :  { %1436 = vst [vmem:[#allocation2 + $0x10] sm:$0xff] %v1431_v63 }
 0x373   :  { %1437 = vst [vmem:[#allocation2 + $0x18] sm:$0xff] %v1432_v0 }
 0x374   :  { %1986 = shalt.err (!%p1983_p4)
}
 0x375   :  { %s1987_s30 = scalar_lea.hbm %s2682_s5, 640 }
 0x376   :  { %p1988_p5 = scmp.ne.s32.totalorder %s2682_s5, %s1987_s30  ;;  %p1991_p6 = scmp.lt.u32.totalorder %s1987_s30, %s2682_s5 }
 0x378   :  { %p1993_p7 = pnand %p1991_p6, %p1988_p5 }
 0x37a   :  { %1996 = shalt.err (!%p1993_p7)
}
 0x37b   :  { %1448 = dma.vmem_to_hbm [thread:$0]  %s1446_s27, 640, %s2682_s5, [#allocation3]  }
 0x37c   :  { %1997 = dma.done.wait [#allocation3], 640  }
 0x37d   :  { %1998 = vsyncadd [#allocation3], 4294966656 }
 0x37e   :  { %1452 = vsyncpa [#allocation3], 1 }

</bundles_post_ra>
